<compile_context>
chip_gen: v6e
topology: v6e:2x2x1
jax: 0.10.0
libtpu: 0.0.40
codegen_flags: <defaults>
</compile_context>

<pallas_src>
import jax
import jax.numpy as jnp
from jax import lax
from jax.experimental import pallas as pl
from jax.experimental.pallas import tpu as pltpu


def _round_up(x, m):
    return -(-x // m) * m


def _sublane_tile(dtype):
    """Second-minor tiling granularity (rows per vreg tile) for `dtype`."""
    return 8 * max(1, 4 // jnp.dtype(dtype).itemsize)


def _vmem_capacity_bytes():
    """Per-TensorCore VMEM of the running chip; conservative (v7x) fallback."""
    try:
        return int(pltpu.get_tpu_info().vmem_capacity_bytes)
    except Exception:
        return 64 * 1024 * 1024


def _pick_tile(s, n_images, per_lane_bytes, budget, *,
               target_lanes=4096, floor_lanes=1024, min_steps=8):
    """Spatial (lane) tile size: a multiple of 128 that
       - keeps per-step VMEM (double-buffered in/out + f32 accumulator) <= budget,
       - is ~1-4 MiB so per-step DMA time dwarfs the ~0.35us grid-step overhead,
       - yields >= min_steps total grid steps so block i+1 prefetch / i-1 writeback
         overlap compute and v7x's two TensorCores both get work."""
    if s <= 128:
        return s                                   # one full-extent block per image
    cap = max(128, (budget // max(per_lane_bytes, 1)) // 128 * 128)
    t = min(target_lanes, cap, (s // 128) * 128)   # never exceed the array extent
    t = max(128, (t // 128) * 128)
    while t > max(floor_lanes, 128) and n_images * (-(-s // t)) < min_steps:
        t -= 128
    return t


def _conv1x1_bn_kernel(x_ref, w_ref, shift_ref, o_ref):
    """out = W @ x + shift for one (image, spatial-tile) grid step.

    x_ref:     (1, Cin, T)   input in its ORIGINAL dtype (cast here, not in HBM)
    w_ref:     (Cout, Cin)   conv weight with BN scale (and pool 1/4) folded in
    shift_ref: (Cout, 1)     f32 BN shift (beta - mean * scale)
    o_ref:     (1, Cout, T)  lane-dense output store
    """
    x = x_ref[0]
    if x.dtype != w_ref.dtype:
        # In-kernel cast: free VPU filler in a mem-bound kernel; avoids the extra
        # read+write HBM pass a wrapper-side astype would cost.
        x = x.astype(w_ref.dtype)
    y = jnp.dot(w_ref[...], x, preferred_element_type=jnp.float32)
    o_ref[0] = (y + shift_ref[...]).astype(o_ref.dtype)


def shortcut_forward(x_nchw, conv_weight, gamma, beta, running_mean, running_var,
                     *, stride=1, avg_downsample=False, eps=1e-5,
                     compute_dtype=jnp.bfloat16, out_dtype=None):
    """RegSeg Shortcut.forward (eval-mode BatchNorm).  NCHW in, NCHW out.

    x_nchw:        (N, Cin, H, W)
    conv_weight:   (Cout, Cin, 1, 1)
    gamma/beta/running_mean/running_var: (Cout,)
    compute_dtype: MXU operand dtype (bf16 default; float32 for exact parity).
    out_dtype:     output dtype (default: x dtype).  Pass bf16 when the consumer
                   accepts it -- the f32 store otherwise dominates HBM traffic.
    """
    n, cin, h, w = x_nchw.shape
    cout = conv_weight.shape[0]
    out_dtype = jnp.dtype(x_nchw.dtype) if out_dtype is None else jnp.dtype(out_dtype)
    compute_dtype = jnp.dtype(compute_dtype)

    # Fold eval-mode BatchNorm into the 1x1 conv: y = (w * scale) @ x + shift.
    inv_std = 1.0 / jnp.sqrt(running_var.astype(jnp.float32) + eps)
    scale = gamma.astype(jnp.float32) * inv_std                         # (Cout,)
    w2 = conv_weight.reshape(cout, cin).astype(jnp.float32) * scale[:, None]
    shift = (beta.astype(jnp.float32)
             - running_mean.astype(jnp.float32) * scale).reshape(cout, 1)

    if avg_downsample and stride != 1:
        # nn.AvgPool2d(2, 2, ceil_mode=True).  Replicate-pad odd edges (with the
        # pool's padding=0, dividing the padded window *sum* by a uniform 1/4 is
        # then exactly ceil_mode's divide-by-valid-count), and fold 1/4 into the
        # conv weight so the kernel epilogue stays a single shift-add.
        # TODO(synk): fuse the 2x2 pool-sum into the kernel (needs a W-axis lane
        # pair-reduction); Exp2_Decoder10 only instantiates the stride=1 path, so
        # the XLA pre-pass is kept for this rarely-used downsampling config.
        ho, wo = -(-h // 2), -(-w // 2)
        xp = x_nchw
        if (h % 2) or (w % 2):
            xp = jnp.pad(xp, ((0, 0), (0, 0), (0, h % 2), (0, w % 2)), mode="edge")
        xp = xp.reshape(n, cin, ho, 2, wo, 2).sum(axis=(3, 5))
        w2 = w2 * 0.25
    elif stride != 1:
        # Strided 1x1 conv == subsample then stride-1 conv.
        # TODO(synk): fuse the subsample into the BlockSpec/kernel; not a path
        # Exp2_Decoder10 instantiates, so the XLA slice pre-pass is kept.
        ho, wo = -(-h // stride), -(-w // stride)
        xp = x_nchw[:, :, ::stride, ::stride]
    else:
        ho, wo = h, w
        xp = x_nchw

    # Flatten spatial onto the 128-wide lane axis (a free row-major reshape in
    # NCHW).  The activation keeps its original dtype: no cast pass in HBM.
    s = ho * wo
    x_flat = xp.reshape(n, cin, s)
    w2 = w2.astype(compute_dtype)                  # tiny resident MXU operand
    in_dt = jnp.dtype(x_flat.dtype)

    # Per-lane VMEM bytes of one grid step: double-buffered input and output
    # blocks, the f32 jnp.dot accumulator, the in-kernel cast temporary, with
    # sublane padding of the channel dims accounted for.
    per_lane_bytes = (
        2 * _round_up(cin, _sublane_tile(in_dt)) * in_dt.itemsize
        + 2 * _round_up(cout, _sublane_tile(out_dtype)) * out_dtype.itemsize
        + _round_up(cout, 8) * 4
        + (_round_up(cin, _sublane_tile(compute_dtype)) * compute_dtype.itemsize
           if compute_dtype != in_dt else 0))

    vmem_cap = _vmem_capacity_bytes()              # 64 MiB/TC on v7x, 128 MiB v5e/v6e
    block_budget = vmem_cap // 4 - (1 << 20)       # headroom for weight/shift/internals
    t = _pick_tile(s, n, per_lane_bytes, block_budget)
    grid = (n, pl.cdiv(s, t))                      # ragged tail -> partial block; no
                                                   # jnp.pad / output-slice HBM passes

    # Note: pipeline_mode=pl.Buffered(3) on the x spec is a further knob for ~1 MiB
    # blocks; default double-buffering already overlaps DMA with compute here.
    out_flat = pl.pallas_call(
        _conv1x1_bn_kernel,
        out_shape=jax.ShapeDtypeStruct((n, cout, s), out_dtype),
        grid_spec=pltpu.PrefetchScalarGridSpec(
            num_scalar_prefetch=0,
            grid=grid,
            in_specs=[
                pl.BlockSpec((1, cin, t), lambda b, j: (b, 0, j)),
                pl.BlockSpec((cout, cin), lambda b, j: (0, 0)),
                pl.BlockSpec((cout, 1), lambda b, j: (0, 0)),
            ],
            out_specs=pl.BlockSpec((1, cout, t), lambda b, j: (b, 0, j)),
        ),
        compiler_params=pltpu.CompilerParams(
            dimension_semantics=("parallel", "parallel"),
            vmem_limit_bytes=int(min(vmem_cap // 2, 64 * 1024 * 1024))),
    )(x_flat, w2, shift)

    return out_flat.reshape(n, cout, ho, wo)


def _reference(x, conv_weight, gamma, beta, running_mean, running_var,
               *, stride=1, avg_downsample=False, eps=1e-5):
    """Pure-JAX (f32, un-tiled) reference of Shortcut.forward in eval mode."""
    if avg_downsample and stride != 1:
        ph, pw = x.shape[2] % 2, x.shape[3] % 2
        window, pad = (1, 1, 2, 2), ((0, 0), (0, 0), (0, ph), (0, pw))
        ssum = lax.reduce_window(x, 0.0, lax.add, window, window, pad)
        cnt = lax.reduce_window(jnp.ones_like(x), 0.0, lax.add, window, window, pad)
        xp = ssum / cnt       # ceil_mode: edge windows divide by the valid count
    elif stride != 1:
        xp = x[:, :, ::stride, ::stride]
    else:
        xp = x
    w2 = conv_weight.reshape(conv_weight.shape[0], conv_weight.shape[1])
    y = jnp.einsum('oc,nchw->nohw', w2, xp)
    inv_std = 1.0 / jnp.sqrt(running_var + eps)
    sc = (gamma * inv_std)[None, :, None, None]
    sh = (beta - running_mean * gamma * inv_std)[None, :, None, None]
    return y * sc + sh


if __name__ == "__main__":
    key = jax.random.PRNGKey(0)
    k_x, k_xo, k_w, k_g, k_b, k_m, k_v = jax.random.split(key, 7)

    N, Cin, Cout, H, W = 2, 4, 8, 16, 16
    x = jax.random.normal(k_x, (N, Cin, H, W), dtype=jnp.float32)
    x_odd = jax.random.normal(k_xo, (N, Cin, 15, 13), dtype=jnp.float32)
    conv_weight = jax.random.normal(k_w, (Cout, Cin, 1, 1), dtype=jnp.float32) * 0.1
    gamma = jax.random.normal(k_g, (Cout,), dtype=jnp.float32) * 0.1 + 1.0
    beta = jax.random.normal(k_b, (Cout,), dtype=jnp.float32) * 0.1
    running_mean = jax.random.normal(k_m, (Cout,), dtype=jnp.float32) * 0.1
    running_var = jnp.abs(jax.random.normal(k_v, (Cout,), dtype=jnp.float32)) + 0.5
    params = (conv_weight, gamma, beta, running_mean, running_var)

    cases = [
        # (input, stride, avg_downsample, extra kwargs, tolerance)
        # First case is the configuration Exp2_Decoder10's DBlock(160->128, stride=1)
        # actually instantiates: plain 1x1 conv -> BN, bf16 MXU operands, f32 out.
        (x, 1, False, dict(), 2e-2),
        # Exact-parity path: f32 MXU operands (tiny resident weight stays f32).
        (x, 1, False, dict(compute_dtype=jnp.float32), 1e-4),
        # bf16 output (halves store-side HBM traffic when the consumer accepts it).
        (x, 1, False, dict(out_dtype=jnp.bfloat16), 3e-2),
        (x, 2, True, dict(), 2e-2),       # AvgPool2d(2,2,ceil) -> conv -> BN, even H/W
        (x_odd, 2, True, dict(), 2e-2),   # ceil_mode with odd H/W (partial edge windows)
        (x, 2, False, dict(), 2e-2),      # strided 1x1 conv -> BN
    ]
    for xi, stride, avg, kw, tol in cases:
        out = shortcut_forward(xi, *params, stride=stride, avg_downsample=avg, **kw)
        out = jax.block_until_ready(out)
        ref = _reference(xi, *params, stride=stride, avg_downsample=avg)
        assert out.shape == ref.shape, (out.shape, ref.shape)
        out_f32 = out.astype(jnp.float32)
        assert jnp.allclose(out_f32, ref, atol=tol, rtol=tol), (
            f"mismatch stride={stride} avg={avg} kw={kw}: "
            f"max abs err {jnp.max(jnp.abs(out_f32 - ref))}")

    print("KERNEL_OK")
</pallas_src>

<mosaic_0001>
module attributes {stable_mosaic.version = 11 : i64} {
  func.func @_conv1x1_bn_kernel(%arg0: i32, %arg1: i32, %arg2: memref<1x4x256xf32, #tpu.memory_space<vmem>>, %arg3: memref<8x4xbf16, #tpu.memory_space<vmem>>, %arg4: memref<8x1xf32, #tpu.memory_space<vmem>>, %arg5: memref<1x8x256xf32, #tpu.memory_space<vmem>>) attributes {dimension_semantics = [#tpu.dimension_semantics<parallel>, #tpu.dimension_semantics<parallel>], iteration_bounds = array<i64: 2, 1>, scalar_prefetch = 0 : i64, scratch_operands = 0 : i64, tpu.core_type = #tpu.core_type<tc>, window_params = [{transform_indices = @transform_0, window_bounds = array<i64: 1, 4, 256>}, {pipeline_mode = #tpu.pipeline_mode<synchronous>, transform_indices = @transform_1, window_bounds = array<i64: 8, 4>}, {pipeline_mode = #tpu.pipeline_mode<synchronous>, transform_indices = @transform_2, window_bounds = array<i64: 8, 1>}, {transform_indices = @transform_3, window_bounds = array<i64: 1, 8, 256>}]} {
    %c0 = arith.constant 0 : index
    %c0_0 = arith.constant 0 : index
    %c0_1 = arith.constant 0 : index
    %0 = vector.load %arg2[%c0, %c0_0, %c0_1] : memref<1x4x256xf32, #tpu.memory_space<vmem>>, vector<1x4x256xf32>
    %1 = vector.shape_cast %0 : vector<1x4x256xf32> to vector<4x256xf32>
    %2 = arith.truncf %1 : vector<4x256xf32> to vector<4x256xbf16>
    %c0_2 = arith.constant 0 : index
    %c0_3 = arith.constant 0 : index
    %3 = vector.load %arg3[%c0_2, %c0_3] : memref<8x4xbf16, #tpu.memory_space<vmem>>, vector<8x4xbf16>
    %cst = arith.constant dense<0.000000e+00> : vector<8x256xf32>
    %4 = tpu.matmul %3, %2, %cst {dimension_numbers = #tpu.dot_dimension_numbers<[1], [0], [0], [1], [0, 0, 1, 1], [], []>} : vector<8x4xbf16>, vector<4x256xbf16>, vector<8x256xf32> -> vector<8x256xf32>
    %c0_4 = arith.constant 0 : index
    %c0_5 = arith.constant 0 : index
    %5 = vector.load %arg4[%c0_4, %c0_5] : memref<8x1xf32, #tpu.memory_space<vmem>>, vector<8x1xf32>
    %6 = vector.broadcast %5 : vector<8x1xf32> to vector<8x256xf32>
    %7 = arith.addf %4, %6 : vector<8x256xf32>
    %c0_6 = arith.constant 0 : index
    %c0_7 = arith.constant 0 : index
    %c0_8 = arith.constant 0 : index
    %8 = vector.load %arg5[%c0_6, %c0_7, %c0_8] : memref<1x8x256xf32, #tpu.memory_space<vmem>>, vector<1x8x256xf32>
    %9 = vector.shape_cast %8 : vector<1x8x256xf32> to vector<8x256xf32>
    %10 = vector.shape_cast %7 : vector<8x256xf32> to vector<1x8x256xf32>
    tpu.vector_store %arg5[%c0_6, %c0_7, %c0_8], %10 {strides = array<i32>} : memref<1x8x256xf32, #tpu.memory_space<vmem>>, vector<1x8x256xf32>,
    return
  }
  func.func @transform_0(%arg0: i32, %arg1: i32) -> (i32, i32, i32) {
    %c0_i32 = arith.constant 0 : i32
    %c0_i32_0 = arith.constant 0 : i32
    return %arg0, %c0_i32, %arg1 : i32, i32, i32
  }
  func.func @transform_1(%arg0: i32, %arg1: i32) -> (i32, i32) {
    %c0_i32 = arith.constant 0 : i32
    %c0_i32_0 = arith.constant 0 : i32
    %c0_i32_1 = arith.constant 0 : i32
    return %c0_i32, %c0_i32_0 : i32, i32
  }
  func.func @transform_2(%arg0: i32, %arg1: i32) -> (i32, i32) {
    %c0_i32 = arith.constant 0 : i32
    %c0_i32_0 = arith.constant 0 : i32
    %c0_i32_1 = arith.constant 0 : i32
    return %c0_i32, %c0_i32_0 : i32, i32
  }
  func.func @transform_3(%arg0: i32, %arg1: i32) -> (i32, i32, i32) {
    %c0_i32 = arith.constant 0 : i32
    %c0_i32_0 = arith.constant 0 : i32
    return %arg0, %c0_i32, %arg1 : i32, i32, i32
  }
}

</mosaic_0001>

<bundles_post_ra>
// kernel: tpu_custom_call.1
= control target key start
LH: loop header
LB: loop body
LE: loop exit
PB: predicated region body
PF: predicated region fallthrough
CT: control target
= control target key end

     0   :  { %8 = vsyncpa [#allocation3], 0  ;;  %s746_s0 = inlined_call_operand.hbm [shape: f32[2,4,256], index: 0, kind: input, shape index: {}]   ;;  %s747_s1 = inlined_call_operand.vmem [shape: bf16[8,4], index: 1, kind: input, shape index: {}]   ;;  %s748_s2 = inlined_call_operand.vmem [shape: f32[8,1], index: 2, kind: input, shape index: {}]   ;;  %s749_s3 = inlined_call_operand.hbm [shape: f32[2,8,256], index: 3, kind: output, shape index: {}]  }
   0x1   :  { %10 = vsyncpa [#allocation3 + $0x1], 0 }
   0x2   :  { %11 = vsyncpa [#allocation4], 0 }
   0x3   :  { %13 = vsyncpa [#allocation4 + $0x1], 0  ;;  %s593_s12 = smov 0   ;;  %s595_s13 = smov 0  }
   0x4   :  { %s597_s14 = smov 0   ;;  %s599_s15 = smov 0  }
   0x5   :  { %s601_s16 = smov 0   ;;  %s603_s17 = smov 0  }
   0x6 LB: > { %s376_s18 = sadd.s32 4294967295, %s568_s17   ;;  %s377_s19 = sadd.s32 4294967294, %s568_s17   ;;  %s568_s17 = sphi %s603_s17, %s19_s17   ;;  %s564_s16 = sphi %s601_s16, %s761_s16   ;;  %s560_s15 = sphi %s599_s15, %s760_s15   ;;  %s556_s14 = sphi %s597_s14, %s759_s14   ;;  %s552_s13 = sphi %s595_s13, %s758_s13   ;;  %s548_s12 = sphi %s593_s12, %s757_s12  }
   0x7   : > { %s31_s20 = sadd.s32 1, %s564_s16  ;;  %s40_s21 = sadd.s32 1, %s556_s14 }
   0x8   : > { %p33_p0 = scmp.ge.s32.totalorder %s31_s20, 2  ;;  %p47_p1 = scmp.ne.s32.totalorder %s556_s14, %s552_s13 }
   0x9   : > { %p48_p2 = scmp.eq.s32.totalorder %s568_s17, 0  ;;  %p53_p3 = scmp.ne.s32.totalorder %s552_s13, %s548_s12 }
   0xa   : > { %s763_s20 = smov (%p33_p0, %s31_s20), 0  ;;  %p54_p5 = scmp.eq.s32.totalorder %s376_s18, 0 }
   0xb   : > { %p634_p4 = por %p48_p2, %p47_p1  ;;  %s35_s23 = ssub.s32 %s564_s16, %s763_s20 }
   0xc   : > { %p121_p6 = scmp.eq.s32.totalorder %s376_s18, 1  ;;  %p38_p7 = scmp.eq.s32.totalorder %s35_s23, 0 }
   0xd   : > { %p640_p8 = por %p54_p5, %p53_p3  ;;  %p127_p10 = scmp.eq.s32.totalorder %s377_s19, 1 }
   0xe   : > { %p644_p9 = por %p121_p6, %p47_p1  ;;  %p407_p13 = scmp.lt.s32.totalorder %s568_s17, 2 }
   0xf   : > { %s649_s26 = scalar_select %p38_p7, %s556_s14, %s40_s21  }
  0x10   : > { %p651_p11 = por %p127_p10, %p53_p3  ;;  %s153_s28 = sand.u32 1, %s556_s14  }
  0x11   : > { %s380_s29 = sshll.u32 %s153_s28, 3  ;;  %s393_s30 = sshll.u32 %s564_s16, 7 }
  0x12   : > { %s753_s27 = scalar_select %p651_p11, 1, 0 }
  0x13   : > { %s165_s6 = scalar_lea.hbm %s746_s0, %s393_s30  ;;  %s157_s7 = scalar_lea.vmem [#allocation2], %s380_s29 }
  0x14   : > { %s167_s8 = sshll.u32 %s157_s7, 4  ;;  %p664_p0 = pnand %p407_p13, %p634_p4  ;;  %s168_s8 = int_to_ptr.vmem [resolvable:$true] %s167_s8 }
  0x15   : > { %p383_p1 = scmp.ge.s32.totalorder %s568_s17, 1  ;;  %p172_p2 = scmp.lt.s32.totalorder %s568_s17, 3 }
  0x16   : > { %s154_s10 = scalar_lea.sflag [#allocation3], %s153_s28  ;;  %p462_p3 = pneg %p664_p0 }
  0x17   : > { %s473_s11 = scalar_lea.vmem %s168_s8, 128  ;;  %s570_s18 = smov [#allocation2]  }
  0x18   : > { %p474_p5 = scmp.ne.s32.totalorder %s168_s8, %s473_s11  ;;  %s478_s19 = sshll.u32 %s570_s18, 4  ;;  %s479_s19 = int_to_ptr.vmem [resolvable:$false] %s478_s19 }
  0x19   : > { %s480_s21 = scalar_lea.vmem %s479_s19, 256  ;;  %p481_p10 = scmp.lt.s32.totalorder %s168_s8, %s479_s19 }
  0x1a   : > { %p476_p6 = pnand %p474_p5, %p462_p3  ;;  %p482_p12 = scmp.lt.s32.totalorder %s480_s21, %s473_s11 }
  0x1c   : > { %p477_p7 = pneg %p476_p6  ;;  %p483_p4 = por %p482_p12, %p481_p10 }
  0x1e   : > { %p484_p13 = pnand %p483_p4, %p477_p7 }
  0x20   : > { %487 = shalt.err (!%p484_p13)
}
  0x21   : > { %402 = dma.hbm_to_vmem [thread:$0]  (!%p664_p0), %s165_s6, 128, %s168_s8, %s154_s10  }
  0x22   : > { %p173_p11 = pnand %p383_p1, %p172_p2 }
  0x23   : > { %s679_s22 = sand.u32 (!%p173_p11), 1, %s552_s13  }
  0x24   : > { %176 = sbr.rel (%p173_p11) target bundleno = 262 (0x106), region = 32  ;;  %s384_s23 = sshll.u32 (!%p173_p11), %s679_s22, 3 }
  0x25   : > { %s179_s28 = scalar_lea.sflag (!%p173_p11), [#allocation3], %s679_s22  ;;  %s182_s29 = scalar_lea.vmem (!%p173_p11), [#allocation2], %s384_s23 }
  0x29   : > { %539 = dma.done.wait (%p640_p8), %s179_s28, 128  }
  0x2a   : > { %541 = vsyncadd (%p640_p8), %s179_s28, 4294967168  ;;  %v571_v0 = vmov 0   ;;  %v208_v1 = vld [vmem:[%s182_s29] sm:$0xff]  ;;  %vm225_vm0 = vcmask 1041408   ;;  %vm221_vm1 = vcmask 31744   ;;  %s385_s6 = sshll.u32 %s679_s22, 4 }
  0x2b   : > { %264 = vmatprep.mubr.bf16.mxu0 %v571_v0  ;;  %458 = vset.pattern.permute.xlu0 %v571_v0  ;;  %v215_v2 = vld [vmem:[%s748_s2] sm:$0xff]  ;;  %v210_v3 = vcombine.high %v208_v1, %v208_v1  ;;  %v212_v4 = vpack.c.bf16 %v208_v1, %v208_v1  ;;  %s394_s7 = sshll.u32 %s560_s15, 8  ;;  %s204_s8 = scalar_lea.vmem [#allocation5], %s385_s6 }
  0x2c   : > { %218 = vperm.xlu0 %458, %v215_v2   ;;  %v214_v7 = vld [vmem:[%s747_s1] sm:$0xf]  ;;  %s292_s9 = sshll.u32 %s204_s8, 4  ;;  %s698_s18 = scalar_lea.hbm %s749_s3, %s394_s7  ;;  %s700_s9 = int_to_ptr.vmem [resolvable:$true] %s292_s9 }
  0x2d   : > { %v213_v5 = vpack.c.bf16 %v210_v3, %v210_v3  ;;  %v227_v6 = vsel %vm225_vm0, %v212_v4, 0  ;;  %s276_s15 = scalar_lea.sflag [#allocation4], %s679_s22  ;;  %s488_s19 = scalar_lea.vmem %s700_s9, 256 }
  0x2e   : > { %p489_p8 = scmp.ne.s32.totalorder %s700_s9, %s488_s19  ;;  %s572_s21 = smov [#allocation5]  }
  0x2f   : > { %386 = vmatprep.subr.msk.bf16.mxu0 %vm225_vm0, %v213_v5  ;;  %s492_s23 = sshll.u32 %s572_s21, 4  ;;  %s493_s23 = int_to_ptr.vmem [resolvable:$false] %s492_s23 }
  0x30   : > { %247 = vmatpush1.bf16.msra.mxu0 %v227_v6  ;;  %p490_p11 = pnand %p489_p8, %p644_p9  ;;  %s494_s28 = scalar_lea.vmem %s493_s23, 512 }
  0x31   : > { %p495_p0 = scmp.lt.s32.totalorder %s700_s9, %s493_s23  ;;  %p496_p1 = scmp.lt.s32.totalorder %s494_s28, %s488_s19 }
  0x32   : > { %p491_p12 = pneg %p490_p11 }
  0x33   : > { %387 = vmatmul.mubr.msk.bf16.vlgmr.msra.gmra.mxu0 %vm221_vm1, %v214_v7  ;;  %p497_p2 = por %p496_p1, %p495_p0 }
  0x35   : > { %p498_p3 = pnand %p497_p2, %p491_p12 }
  0xa7   : > { %v219_v8 = vpop.permute.xlu0 %218 }
  0xf3   : > { %v266_v9 = vpop.f32.mrf.mxu0 }
  0xf4   : > { %v267_v10 = vadd.f32 %v266_v9, %v219_v8 }
  0xf5   : > { %v268_v11 = vpop.f32.mrf.mxu0 }
  0xf6   : > { %273 = vst [vmem:[%s204_s8] sm:$0xff] %v267_v10  ;;  %v269_v12 = vadd.f32 %v268_v11, %v219_v8 }
  0xf7   : > { %v270_v13 = vpop.f32.mrf.mxu0 }
  0xf8   : > { %274 = vst [vmem:[%s204_s8 + $0x8] sm:$0xff] %v269_v12 }
  0xf9   : > { %v271_v14 = vpop.f32.mrf.mxu0 }
  0xfa   : > { %501 = shalt.err (!%p498_p3)
}
  0xfb   : > { %s502_s29 = scalar_lea.hbm %s698_s18, 256  ;;  %s506_s4 = scalar_lea.hbm %s749_s3, 512 }
  0xfc   : > { %p503_p5 = scmp.ne.s32.totalorder %s698_s18, %s502_s29  ;;  %p507_p10 = scmp.lt.s32.totalorder %s698_s18, %s749_s3 }
  0xfd   : > { %p508_p4 = scmp.lt.s32.totalorder %s506_s4, %s502_s29 }
  0xfe   : > { %p504_p6 = pnand %p503_p5, %p644_p9 }
  0xff   : > { %p509_p13 = por %p508_p4, %p507_p10 }
 0x100   : > { %p505_p7 = pneg %p504_p6 }
 0x102   : > { %p510_p8 = pnand %p509_p13, %p505_p7 }
 0x104   : > { %513 = shalt.err (!%p510_p8)
}
 0x105   : > { %397 = dma.vmem_to_hbm [thread:$0]  (%p644_p9), %s700_s9, 256, %s698_s18, %s276_s15  }
 0x106 PF: > { %s304_s6 = sand.u32 1, %s548_s12   ;;  %p755_p11 = scmp.ne.s32.totalorder %s753_s27, 0 }
 0x107   : > { %p756_p12 = scmp.ge.s32.totalorder %s568_s17, 2  ;;  %s305_s7 = scalar_lea.sflag [#allocation4], %s304_s6 }
 0x109   : > { %p404_p0 = pnand %p756_p12, %p755_p11 }
 0x10b   : > { %p405_p1 = pneg %p404_p0 }
 0x10d   : > { %543 = dma.done.wait (%p405_p1), %s305_s7, 256  }
 0x10e   : > { %545 = vsyncadd (%p405_p1), %s305_s7, 4294967040  ;;  %s19_s17 = sadd.s32 1, %s568_s17   ;;  %s757_s12 = smov %s552_s13 }
 0x10f   : > { %p16_p2 = scmp.ge.s32.totalorder %s19_s17, 4   ;;  %s758_s13 = smov %s556_s14 }
 0x110   : > { %s759_s14 = smov %s649_s26  ;;  %s760_s15 = smov %s564_s16 }
 0x111   : > { %s761_s16 = smov %s763_s20  ;;  %18 = sbr.rel (!%p16_p2) target bundleno = 6 (0x6), region = 77 }
 0x116   :  { %310 = vsyncpa [#allocation3], 1 }
 0x117   :  { %312 = vsyncpa [#allocation3 + $0x1], 1 }
 0x118   :  { %313 = vsyncpa [#allocation4], 1 }
 0x119   :  { %315 = vsyncpa [#allocation4 + $0x1], 1 }

</bundles_post_ra>
